<compile_context>
chip_gen: v7x
topology: tpu7x:2x2x1
jax: 0.10.0
libtpu: 0.0.40
codegen_flags: <defaults>
</compile_context>

<pallas_src>
import jax
import jax.numpy as jnp
from jax.experimental import pallas as pl
from jax.experimental.pallas import tpu as pltpu

SEQ_LEN = 6
INPUT_SIZE = 1
HIDDEN_SIZE = 1
OUTPUT_SIZE = 1

LANE = 128        # batch -> lanes (fast axis)
ROW_ALIGN = 16    # sublane-row granularity (also valid for bf16 packing)
MAX_R_TILE = 1024 # sublane rows per grid step (1024 rows * 128 lanes = 128K seqs)
                  # sweep: 512/1024/2048 on v7x (64 MiB VMEM), up to 4096 on v6e
                  # (raise vmem_limit_bytes accordingly).


def _round_up(x, m):
    return (x + m - 1) // m * m


def _choose_r_tile(r_rows):
    """Pick the sublane-row tile: big enough to amortize the ~600-cycle
    per-grid-step overhead, small enough to double-buffer comfortably in VMEM,
    and split into >= 2 grid steps (megacore) whenever there is enough work."""
    if r_rows <= ROW_ALIGN:
        return ROW_ALIGN
    if r_rows <= 2 * MAX_R_TILE:
        return min(MAX_R_TILE, _round_up(pl.cdiv(r_rows, 2), ROW_ALIGN))
    return MAX_R_TILE


def rnn_kernel(scal_ref, x_ref, o_ref):
    """One batch tile of R_TILE * 128 sequences.

    scal_ref: SMEM f32[11] = [w_ih, w_hh, b_ih, b_hh, b_fc, w_fc[0..5]]
    x_ref:    VMEM [T, R_TILE, 128]   (time, batch-sublane-row, batch-lane)
    o_ref:    VMEM f32[R_TILE, 128]   lane-dense per-sequence output
    """
    shape = o_ref.shape

    # Hoisted scalar reads + one-time splats (JAX does not CSE broadcast_in_dim;
    # doing this inside the 6x unroll would re-splat every step).
    w_ih = jnp.full(shape, scal_ref[0], jnp.float32)
    w_hh = jnp.full(shape, scal_ref[1], jnp.float32)
    b = jnp.full(shape, scal_ref[2] + scal_ref[3], jnp.float32)  # b_ih + b_hh folded
    wf = [scal_ref[5 + t] for t in range(SEQ_LEN)]               # FC weights per step

    h = jnp.zeros(shape, jnp.float32)               # h0 = 0 (nn.RNN default)
    y = jnp.full(shape, scal_ref[4], jnp.float32)   # FC accumulator seeded with b_fc

    # Static unrolled time loop (T = 6): pure VPU FMAs + EUP tanh, no MXU/XLU.
    for t in range(SEQ_LEN):
        x_t = x_ref[t].astype(jnp.float32)          # upcast if x stored as bf16
        h = jnp.tanh(x_t * w_ih + h * w_hh + b)
        y = y + h * wf[t]

    o_ref[...] = y.astype(o_ref.dtype)


def rnn_forward_timemajor(x_tm, params):
    """Core Pallas entry point.

    x_tm: (SEQ_LEN, R, 128) time-major, sequence b at (b // 128, b % 128);
          R must be a multiple of ROW_ALIGN.  This is the layout an upstream
          producer should emit directly (see note in rnn_forward).
    returns: (R, 128) f32 per-sequence outputs in the same batch layout.
    """
    T, R, L = x_tm.shape
    assert T == SEQ_LEN and L == LANE and R % ROW_ALIGN == 0

    # Pack all 11 scalar parameters into one small SMEM operand.
    scal = jnp.concatenate([
        params["w_ih"].reshape(-1),   # [0]
        params["w_hh"].reshape(-1),   # [1]
        params["b_ih"].reshape(-1),   # [2]
        params["b_hh"].reshape(-1),   # [3]
        params["b_fc"].reshape(-1),   # [4]
        params["w_fc"].reshape(-1),   # [5 : 5+T]
    ]).astype(jnp.float32)

    r_tile = _choose_r_tile(R)
    n_tiles = pl.cdiv(R, r_tile)
    R_pad = n_tiles * r_tile
    if R_pad != R:
        x_tm = jnp.pad(x_tm, ((0, 0), (0, R_pad - R), (0, 0)))

    x_block_bytes = T * r_tile * LANE * x_tm.dtype.itemsize
    out_block_bytes = r_tile * LANE * 4
    vmem_need = 2 * (x_block_bytes + out_block_bytes) + (2 << 20)  # double-buffered + slack

    cost = pl.CostEstimate(
        flops=13 * T * R_pad * LANE,
        transcendentals=T * R_pad * LANE,
        bytes_accessed=(T * x_tm.dtype.itemsize + 4) * R_pad * LANE + scal.size * 4,
    )

    out = pl.pallas_call(
        rnn_kernel,
        out_shape=jax.ShapeDtypeStruct((R_pad, LANE), jnp.float32),
        grid=(n_tiles,),
        in_specs=[
            pl.BlockSpec(memory_space=pltpu.MemorySpace.SMEM),            # 11 scalars
            pl.BlockSpec((SEQ_LEN, r_tile, LANE), lambda i: (0, i, 0)),   # x tile
            # NOTE: if a trace shows exposed DMA at the first grid steps, add
            # pipeline_mode=pl.Buffered(3) on the x spec (budget the extra VMEM).
        ],
        out_specs=pl.BlockSpec((r_tile, LANE), lambda i: (i, 0)),
        compiler_params=pltpu.CompilerParams(
            dimension_semantics=("parallel",),   # shard batch tiles across TCs
            vmem_limit_bytes=min(max(vmem_need, 16 << 20), 48 << 20),
        ),
        cost_estimate=cost,
    )(scal, x_tm)
    return out[:R]


def rnn_forward(x, params, *, x_hbm_dtype=jnp.float32):
    """x: (B, T, 1) f32 -> (B, 1) f32, matching RNNNet.forward (batch_first).

    Layout plumbing (pad + transpose to time-major, batch-on-lanes) lives here.
    # TODO(synk): in the real pipeline the data producer should emit x directly
    # in the (T, R, 128) layout (or fuse this pad/transpose into the upstream
    # op) — a standalone XLA transpose pass re-reads/re-writes all of x and
    # roughly doubles end-to-end HBM traffic on bandwidth-bound v5e.
    """
    B, T, I = x.shape
    assert T == SEQ_LEN and I == INPUT_SIZE
    # Kernel is specialized to the module's H = I = O = 1 scalar weights.
    assert params["w_ih"].shape == (HIDDEN_SIZE, INPUT_SIZE)
    assert params["w_hh"].shape == (HIDDEN_SIZE, HIDDEN_SIZE)
    assert params["w_fc"].shape == (OUTPUT_SIZE, SEQ_LEN * HIDDEN_SIZE)

    x2d = x.reshape(B, SEQ_LEN).astype(jnp.float32)
    R = _round_up(pl.cdiv(B, LANE), ROW_ALIGN)
    B_pad = R * LANE
    if B_pad != B:
        x2d = jnp.pad(x2d, ((0, B_pad - B), (0, 0)))     # padded rows are zeros
    x_tm = x2d.T.reshape(SEQ_LEN, R, LANE).astype(x_hbm_dtype)

    out = rnn_forward_timemajor(x_tm, params)            # (R, 128)
    return out.reshape(B_pad)[:B].reshape(B, OUTPUT_SIZE)


def rnn_reference(x, params):
    """Plain-JAX reference mirroring PyTorch nn.RNN(tanh) + nn.Linear."""
    B = x.shape[0]
    w_ih, w_hh = params["w_ih"], params["w_hh"]
    b_ih, b_hh = params["b_ih"], params["b_hh"]
    w_fc, b_fc = params["w_fc"], params["b_fc"]
    h = jnp.zeros((B, HIDDEN_SIZE), jnp.float32)
    outs = []
    for t in range(SEQ_LEN):
        h = jnp.tanh(x[:, t, :] @ w_ih.T + b_ih + h @ w_hh.T + b_hh)
        outs.append(h)
    o = jnp.concatenate(outs, axis=1)          # (B, T*H)
    return o @ w_fc.T + b_fc                   # (B, 1)


def init_params(key):
    # Deterministic synthetic params with the shapes RNNNet.__init__ implies.
    ks = jax.random.split(key, 6)
    u = lambda k, shape, bound: jax.random.uniform(k, shape, jnp.float32, -bound, bound)
    bound = 1.0  # 1/sqrt(hidden_size) with hidden_size = 1
    fc_bound = 1.0 / jnp.sqrt(float(SEQ_LEN * HIDDEN_SIZE))
    return {
        "w_ih": u(ks[0], (HIDDEN_SIZE, INPUT_SIZE), bound),
        "w_hh": u(ks[1], (HIDDEN_SIZE, HIDDEN_SIZE), bound),
        "b_ih": u(ks[2], (HIDDEN_SIZE,), bound),
        "b_hh": u(ks[3], (HIDDEN_SIZE,), bound),
        "w_fc": u(ks[4], (OUTPUT_SIZE, SEQ_LEN * HIDDEN_SIZE), fc_bound),
        "b_fc": u(ks[5], (OUTPUT_SIZE,), fc_bound),
    }


if __name__ == "__main__":
    key = jax.random.PRNGKey(0)
    k_x, k_p = jax.random.split(key)
    params = init_params(k_p)

    # Small batch, deliberately not a tile multiple: exercises padding and a
    # 2-step "parallel" grid.
    BATCH = 3000
    x = jax.random.normal(k_x, (BATCH, SEQ_LEN, INPUT_SIZE), jnp.float32)

    y = jax.block_until_ready(rnn_forward(x, params))
    y_ref = jax.block_until_ready(rnn_reference(x, params))
    assert y.shape == (BATCH, OUTPUT_SIZE)
    assert jnp.allclose(y, y_ref, atol=1e-5, rtol=1e-5), (
        float(jnp.max(jnp.abs(y - y_ref))))

    # Optional bf16-in-HBM input (halves the dominant HBM read on v5e);
    # arithmetic stays f32, so only input-quantization error remains.
    y_bf16 = jax.block_until_ready(
        rnn_forward(x, params, x_hbm_dtype=jnp.bfloat16))
    assert jnp.allclose(y_bf16, y_ref, atol=1e-1, rtol=1e-1), (
        float(jnp.max(jnp.abs(y_bf16 - y_ref))))

    # TODO(synk): meta_training / Testing (asynchronous client federation loop,
    # reptile weight averaging, file I/O, metric dumps) are host-side
    # orchestration with no kernel body.

    print("KERNEL_OK")
</pallas_src>

<mosaic_0001>
module attributes {stable_mosaic.version = 11 : i64} {
  func.func @rnn_kernel(%arg0: i32, %arg1: memref<11xf32, #tpu.memory_space<smem>>, %arg2: memref<6x16x128xf32, #tpu.memory_space<vmem>>, %arg3: memref<16x128xf32, #tpu.memory_space<vmem>>) attributes {dimension_semantics = [#tpu.dimension_semantics<parallel>], iteration_bounds = array<i64: 2>, scalar_prefetch = 0 : i64, scratch_operands = 0 : i64, tpu.core_type = #tpu.core_type<tc>, window_params = [{transform_indices = @transform_0, window_bounds = array<i64: 11>}, {transform_indices = @transform_1, window_bounds = array<i64: 6, 16, 128>}, {transform_indices = @transform_2, window_bounds = array<i64: 16, 128>}]} {
    %c0 = arith.constant 0 : index
    %0 = memref.load %arg1[%c0] : memref<11xf32, #tpu.memory_space<smem>>
    %1 = vector.broadcast %0 : f32 to vector<16x128xf32>
    %c1 = arith.constant 1 : index
    %2 = memref.load %arg1[%c1] : memref<11xf32, #tpu.memory_space<smem>>
    %3 = vector.broadcast %2 : f32 to vector<16x128xf32>
    %c2 = arith.constant 2 : index
    %4 = memref.load %arg1[%c2] : memref<11xf32, #tpu.memory_space<smem>>
    %c3 = arith.constant 3 : index
    %5 = memref.load %arg1[%c3] : memref<11xf32, #tpu.memory_space<smem>>
    %6 = arith.addf %4, %5 : f32
    %7 = vector.broadcast %6 : f32 to vector<16x128xf32>
    %c5 = arith.constant 5 : index
    %8 = memref.load %arg1[%c5] : memref<11xf32, #tpu.memory_space<smem>>
    %c6 = arith.constant 6 : index
    %9 = memref.load %arg1[%c6] : memref<11xf32, #tpu.memory_space<smem>>
    %c7 = arith.constant 7 : index
    %10 = memref.load %arg1[%c7] : memref<11xf32, #tpu.memory_space<smem>>
    %c8 = arith.constant 8 : index
    %11 = memref.load %arg1[%c8] : memref<11xf32, #tpu.memory_space<smem>>
    %c9 = arith.constant 9 : index
    %12 = memref.load %arg1[%c9] : memref<11xf32, #tpu.memory_space<smem>>
    %c10 = arith.constant 10 : index
    %13 = memref.load %arg1[%c10] : memref<11xf32, #tpu.memory_space<smem>>
    %cst = arith.constant 0.000000e+00 : f32
    %14 = vector.broadcast %cst : f32 to vector<16x128xf32>
    %c4 = arith.constant 4 : index
    %15 = memref.load %arg1[%c4] : memref<11xf32, #tpu.memory_space<smem>>
    %16 = vector.broadcast %15 : f32 to vector<16x128xf32>
    %c0_0 = arith.constant 0 : index
    %c0_1 = arith.constant 0 : index
    %c0_2 = arith.constant 0 : index
    %17 = vector.load %arg2[%c0_0, %c0_1, %c0_2] : memref<6x16x128xf32, #tpu.memory_space<vmem>>, vector<1x16x128xf32>
    %18 = vector.shape_cast %17 : vector<1x16x128xf32> to vector<16x128xf32>
    %19 = arith.mulf %18, %1 : vector<16x128xf32>
    %20 = arith.mulf %14, %3 : vector<16x128xf32>
    %21 = arith.addf %19, %20 : vector<16x128xf32>
    %22 = arith.addf %21, %7 : vector<16x128xf32>
    %23 = math.tanh %22 : vector<16x128xf32>
    %24 = vector.broadcast %8 : f32 to vector<16x128xf32>
    %25 = arith.mulf %23, %24 : vector<16x128xf32>
    %26 = arith.addf %16, %25 : vector<16x128xf32>
    %c1_3 = arith.constant 1 : index
    %c0_4 = arith.constant 0 : index
    %c0_5 = arith.constant 0 : index
    %27 = vector.load %arg2[%c1_3, %c0_4, %c0_5] : memref<6x16x128xf32, #tpu.memory_space<vmem>>, vector<1x16x128xf32>
    %28 = vector.shape_cast %27 : vector<1x16x128xf32> to vector<16x128xf32>
    %29 = arith.mulf %28, %1 : vector<16x128xf32>
    %30 = arith.mulf %23, %3 : vector<16x128xf32>
    %31 = arith.addf %29, %30 : vector<16x128xf32>
    %32 = arith.addf %31, %7 : vector<16x128xf32>
    %33 = math.tanh %32 : vector<16x128xf32>
    %34 = vector.broadcast %9 : f32 to vector<16x128xf32>
    %35 = arith.mulf %33, %34 : vector<16x128xf32>
    %36 = arith.addf %26, %35 : vector<16x128xf32>
    %c2_6 = arith.constant 2 : index
    %c0_7 = arith.constant 0 : index
    %c0_8 = arith.constant 0 : index
    %37 = vector.load %arg2[%c2_6, %c0_7, %c0_8] : memref<6x16x128xf32, #tpu.memory_space<vmem>>, vector<1x16x128xf32>
    %38 = vector.shape_cast %37 : vector<1x16x128xf32> to vector<16x128xf32>
    %39 = arith.mulf %38, %1 : vector<16x128xf32>
    %40 = arith.mulf %33, %3 : vector<16x128xf32>
    %41 = arith.addf %39, %40 : vector<16x128xf32>
    %42 = arith.addf %41, %7 : vector<16x128xf32>
    %43 = math.tanh %42 : vector<16x128xf32>
    %44 = vector.broadcast %10 : f32 to vector<16x128xf32>
    %45 = arith.mulf %43, %44 : vector<16x128xf32>
    %46 = arith.addf %36, %45 : vector<16x128xf32>
    %c3_9 = arith.constant 3 : index
    %c0_10 = arith.constant 0 : index
    %c0_11 = arith.constant 0 : index
    %47 = vector.load %arg2[%c3_9, %c0_10, %c0_11] : memref<6x16x128xf32, #tpu.memory_space<vmem>>, vector<1x16x128xf32>
    %48 = vector.shape_cast %47 : vector<1x16x128xf32> to vector<16x128xf32>
    %49 = arith.mulf %48, %1 : vector<16x128xf32>
    %50 = arith.mulf %43, %3 : vector<16x128xf32>
    %51 = arith.addf %49, %50 : vector<16x128xf32>
    %52 = arith.addf %51, %7 : vector<16x128xf32>
    %53 = math.tanh %52 : vector<16x128xf32>
    %54 = vector.broadcast %11 : f32 to vector<16x128xf32>
    %55 = arith.mulf %53, %54 : vector<16x128xf32>
    %56 = arith.addf %46, %55 : vector<16x128xf32>
    %c4_12 = arith.constant 4 : index
    %c0_13 = arith.constant 0 : index
    %c0_14 = arith.constant 0 : index
    %57 = vector.load %arg2[%c4_12, %c0_13, %c0_14] : memref<6x16x128xf32, #tpu.memory_space<vmem>>, vector<1x16x128xf32>
    %58 = vector.shape_cast %57 : vector<1x16x128xf32> to vector<16x128xf32>
    %59 = arith.mulf %58, %1 : vector<16x128xf32>
    %60 = arith.mulf %53, %3 : vector<16x128xf32>
    %61 = arith.addf %59, %60 : vector<16x128xf32>
    %62 = arith.addf %61, %7 : vector<16x128xf32>
    %63 = math.tanh %62 : vector<16x128xf32>
    %64 = vector.broadcast %12 : f32 to vector<16x128xf32>
    %65 = arith.mulf %63, %64 : vector<16x128xf32>
    %66 = arith.addf %56, %65 : vector<16x128xf32>
    %c5_15 = arith.constant 5 : index
    %c0_16 = arith.constant 0 : index
    %c0_17 = arith.constant 0 : index
    %67 = vector.load %arg2[%c5_15, %c0_16, %c0_17] : memref<6x16x128xf32, #tpu.memory_space<vmem>>, vector<1x16x128xf32>
    %68 = vector.shape_cast %67 : vector<1x16x128xf32> to vector<16x128xf32>
    %69 = arith.mulf %68, %1 : vector<16x128xf32>
    %70 = arith.mulf %63, %3 : vector<16x128xf32>
    %71 = arith.addf %69, %70 : vector<16x128xf32>
    %72 = arith.addf %71, %7 : vector<16x128xf32>
    %73 = math.tanh %72 : vector<16x128xf32>
    %74 = vector.broadcast %13 : f32 to vector<16x128xf32>
    %75 = arith.mulf %73, %74 : vector<16x128xf32>
    %76 = arith.addf %66, %75 : vector<16x128xf32>
    %c0_18 = arith.constant 0 : index
    %c0_19 = arith.constant 0 : index
    %77 = vector.load %arg3[%c0_18, %c0_19] : memref<16x128xf32, #tpu.memory_space<vmem>>, vector<16x128xf32>
    tpu.vector_store %arg3[%c0_18, %c0_19], %76 {strides = array<i32>} : memref<16x128xf32, #tpu.memory_space<vmem>>, vector<16x128xf32>,
    return
  }
  func.func @transform_0(%arg0: i32) -> i32 {
    %c0_i32 = arith.constant 0 : i32
    %c0_i32_0 = arith.constant 0 : i32
    return %c0_i32 : i32
  }
  func.func @transform_1(%arg0: i32) -> (i32, i32, i32) {
    %c0_i32 = arith.constant 0 : i32
    %c0_i32_0 = arith.constant 0 : i32
    %c0_i32_1 = arith.constant 0 : i32
    return %c0_i32, %arg0, %c0_i32_0 : i32, i32, i32
  }
  func.func @transform_2(%arg0: i32) -> (i32, i32) {
    %c0_i32 = arith.constant 0 : i32
    %c0_i32_0 = arith.constant 0 : i32
    return %arg0, %c0_i32 : i32, i32
  }
}

</mosaic_0001>

<bundles_post_ra>
// kernel: tpu_custom_call.1
= control target key start
LH: loop header
LB: loop body
LE: loop exit
PB: predicated region body
PF: predicated region fallthrough
CT: control target
= control target key end

     0   :  { %7 = vsyncpa [#allocation5], 0  ;;  %s890_s0 = inlined_call_operand.hbm [shape: f32[11], index: 0, kind: input, shape index: {}]   ;;  %s891_s1 = inlined_call_operand.hbm [shape: f32[6,32,128], index: 1, kind: input, shape index: {}]   ;;  %s892_s2 = inlined_call_operand.hbm [shape: f32[32,128], index: 2, kind: output, shape index: {}]  }
   0x1   :  { %8 = vsyncpa [#allocation3], 0 }
   0x2   :  { %10 = vsyncpa [#allocation3 + $0x1], 0 }
   0x3   :  { %11 = vsyncpa [#allocation4], 0 }
   0x4   :  { %13 = vsyncpa [#allocation4 + $0x1], 0  ;;  %s665_s9 = smov 0   ;;  %s667_s10 = smov 0  }
   0x5   :  { %s669_s11 = smov 0   ;;  %s671_s12 = smov 0  }
   0x6 LB: > { %s686_s13 = sadd.s32 4294967295, %s638_s12   ;;  %s424_s14 = sadd.s32 4294967294, %s638_s12   ;;  %s638_s12 = sphi %s671_s12, %s901_s12   ;;  %s634_s11 = sphi %s669_s11, %s900_s11   ;;  %s630_s10 = sphi %s667_s10, %s899_s10   ;;  %s626_s9 = sphi %s665_s9, %s898_s9  }
   0x7   : > { %s690_s15 = sadd.s32 1, %s638_s12   ;;  %s47_s16 = sadd.s32 1, %s634_s11 }
   0x8   : > { %s44_s17 = ssub.s32 %s638_s12, %s690_s15  ;;  %p54_p0 = scmp.ne.s32.totalorder %s634_s11, %s630_s10 }
   0x9   : > { %p45_p1 = scmp.eq.s32.totalorder %s44_s17, 0  ;;  %p55_p2 = scmp.eq.s32.totalorder %s638_s12, 0 }
   0xa   : > { %p60_p3 = scmp.ne.s32.totalorder %s630_s10, %s626_s9  ;;  %p61_p4 = scmp.eq.s32.totalorder %s686_s13, 0 }
   0xb   : > { %s702_s18 = scalar_select %p45_p1, %s634_s11, %s47_s16  }
   0xc   : > { %p704_p5 = por %p55_p2, %p54_p0  ;;  %p710_p6 = por %p61_p4, %p60_p3 }
   0xd   : > { %p84_p7 = scmp.eq.s32.totalorder %s686_s13, 1  ;;  %p90_p8 = scmp.eq.s32.totalorder %s424_s14, 1 }
   0xe   : > { %p425_p9 = scmp.ge.s32.totalorder %s638_s12, 1  ;;  %p97_p10 = scmp.lt.s32.totalorder %s638_s12, 3 }
   0xf   : > { %p717_p11 = por %p84_p7, %p54_p0  ;;  %p721_p12 = por %p90_p8, %p60_p3 }
  0x10   : > { %p725_p13 = pnand %p425_p9, %p97_p10  ;;  %s555_s26 = scalar_lea.hbm %s890_s0, 16 }
  0x11   : > { %p556_p0 = scmp.ne.s32.totalorder %s890_s0, %s555_s26  ;;  %p562_p9 = scmp.lt.u32.totalorder %s555_s26, %s890_s0 }
  0x12   : > { %p479_p1 = pneg %p725_p13 }
  0x14   : > { %p480_p2 = pnand %p479_p1, %p61_p4 }
  0x16   : > { %p557_p3 = pneg %p480_p2 }
  0x18   : > { %p558_p7 = pnand %p557_p3, %p556_p0 }
  0x1a   : > { %p559_p8 = pneg %p558_p7 }
  0x1c   : > { %p564_p10 = pnand %p562_p9, %p559_p8 }
  0x1e   : > { %567 = shalt.err (!%p564_p10)
}
  0x1f   : > { %s640_s3 = smov [#allocation2]   ;;  %p427_p1 = scmp.ge.s32.totalorder %s638_s12, 2 }
  0x20   : > { %482 = dma.hbm_to_smem (!%p480_p2), %s890_s0, 16, %s640_s3, [#allocation5]  }
  0x21   : > { %115 = sbr.rel (%p427_p1) target bundleno = 54 (0x36), region = 20 }
  0x28   : > { %s119_s6 = sand.u32 1, %s634_s11   ;;  %s460_s8 = sshll.u32 %s638_s12, 8 }
  0x29   : > { %s462_s7 = smul.u32 96, %s119_s6  ;;  %s641_s14 = smov 512  }
  0x2a   : > { %467 = sst [smem:[#allocation9]] (%p704_p5), %s641_s14  ;;  %s129_s25 = scalar_lea.hbm %s891_s1, %s460_s8 }
  0x2b   : > { %s466_s16 = scalar_select %p704_p5, [#allocation0], [#allocation10] }
  0x2c   : > { %s123_s27 = scalar_lea.vmem [#allocation6], %s462_s7  ;;  %s642_s29 = smov 256  }
  0x2d   : > { %s134_s26 = sld [smem:[%s466_s16]]   ;;  %s142_s28 = sshll.u32 %s123_s27, 4  ;;  %s143_s28 = int_to_ptr.vmem [resolvable:$true] %s142_s28 }
  0x2e   : > { %468 = sst [smem:[#allocation9 + $0x1]] (%p704_p5), %s642_s29  ;;  %s643_s30 = smov 2  }
  0x2f   : > { %469 = sst [smem:[#allocation9 + $0x2]] (%p704_p5), %s643_s30  ;;  %s644_s3 = smov 128  }
  0x30   : > { %470 = sst [smem:[#allocation9 + $0x3]] (%p704_p5), %s644_s3  ;;  %s645_s4 = smov 8  }
  0x31   : > { %471 = sst [smem:[#allocation9 + $0x4]] (%p704_p5), %s644_s3  ;;  %s120_s7 = scalar_lea.sflag [#allocation3], %s119_s6 }
  0x32   : > { %472 = sst [smem:[#allocation9 + $0x5]] (%p704_p5), %s645_s4  ;;  %s646_s14 = smov [#allocation8]  }
  0x33   : > { %s430_s5 = sshll.u32 %s134_s26, 26 }
  0x34   : > { %s431_s8 = sadd.s32 134217728, %s430_s5 }
  0x35   : > { %473 = dma.general (%p704_p5), %s129_s25, 1536, %s143_s28, %s120_s7, %s646_s14, [#allocation9], %s431_s8, 0  }
  0x36 PF: > { %167 = sbr.rel (%p725_p13) target bundleno = 198 (0xc6), region = 28 }
  0x3d   : > { %613 = dma.done.wait (%p61_p4), [#allocation5], 16  }
  0x3e   : > { %615 = vsyncadd (%p61_p4), [#allocation5], 4294967280  ;;  %s776_s16 = sand.u32 1, %s630_s10  }
  0x3f   : > { %s463_s6 = smul.u32 96, %s776_s16  ;;  %s174_s17 = scalar_lea.sflag [#allocation3], %s776_s16 }
  0x41   : > { %s780_s19 = scalar_lea.vmem [#allocation6], %s463_s6 }
  0x42   : > { %617 = dma.done.wait (%p710_p6), %s174_s17, 1536  }
  0x43   : > { %619 = vsyncadd (%p710_p6), %s174_s17, 4294965760 }
  0x44   : > { %182 = sfence }
  0x45   : > { %s201_s23 = sld [smem:[#allocation2]]  ;;  %s435_s24 = sld [smem:[#allocation2 + $0x1]]  ;;  %v217_v0 = vld [vmem:[%s780_s19] sm:$0xff]  ;;  %v218_v2 = vld [vmem:[%s780_s19 + $0x8] sm:$0xff]  ;;  %v445_v12 = vld [vmem:[%s780_s19 + $0x10] sm:$0xff] }
  0x46   : > { %s436_s25 = sld [smem:[#allocation2 + $0x2]]  ;;  %s437_s26 = sld [smem:[#allocation2 + $0x3]]  ;;  %v446_v13 = vld [vmem:[%s780_s19 + $0x18] sm:$0xff]  ;;  %v447_v27 = vld [vmem:[%s780_s19 + $0x20] sm:$0xff]  ;;  %v448_v29 = vld [vmem:[%s780_s19 + $0x28] sm:$0xff] }
  0x47   : > { %s438_s20 = sld [smem:[#allocation2 + $0x5]]  ;;  %s444_s28 = sld [smem:[#allocation2 + $0x4]]  ;;  %v449_v47 = vld [vmem:[%s780_s19 + $0x30] sm:$0xff]  ;;  %v450_v48 = vld [vmem:[%s780_s19 + $0x38] sm:$0xff]  ;;  %v451_v59 = vld [vmem:[%s780_s19 + $0x40] sm:$0xff] }
  0x48   : > { %s439_s29 = sld [smem:[#allocation2 + $0x6]]  ;;  %s440_s30 = sld [smem:[#allocation2 + $0x7]]  ;;  %v452_v60 = vld [vmem:[%s780_s19 + $0x48] sm:$0xff] }
  0x49   : > { %s441_s3 = sld [smem:[#allocation2 + $0x8]]  ;;  %s442_s4 = sld [smem:[#allocation2 + $0x9]] }
  0x4a   : > { %s443_s5 = sld [smem:[#allocation2 + $0xa]]  ;;  %s434_s8 = sshll.u32 %s776_s16, 4 }
  0x4b   : > { %v787_v1 = vstv %s201_s23  ;;  %v790_v3 = vstv %s435_s24  ;;  %s198_s7 = scalar_lea.vmem [#allocation7], %s434_s8  ;;  %s461_s6 = sshll.u32 %s686_s13, 8 }
  0x4c   : > { %v219_v4 = vmul.f32 %v217_v0, %v787_v1  ;;  %s207_s27 = sadd.f32 %s437_s26, %s436_s25  ;;  %v221_v5 = vmul.f32 0.0, %v790_v3  ;;  %v220_v6 = vmul.f32 %v218_v2, %v787_v1  ;;  %v236_v14 = vmul.f32 %v445_v12, %v787_v1  ;;  %s339_s14 = sshll.u32 %s198_s7, 4  ;;  %s841_s14 = int_to_ptr.vmem [resolvable:$true] %s339_s14 }
  0x4d   : > { %v237_v16 = vmul.f32 %v446_v13, %v787_v1  ;;  %v228_v24 = vstv %s438_s20  ;;  %v216_v26 = vstv %s444_s28  ;;  %v254_v32 = vmul.f32 %v447_v27, %v787_v1  ;;  %s846_s23 = scalar_lea.hbm %s892_s2, %s461_s6  ;;  %s326_s24 = scalar_lea.sflag [#allocation4], %s776_s16 }
  0x4e   : > { %v795_v7 = vstv %s207_s27  ;;  %v222_v8 = vadd.f32 %v221_v5, %v219_v4  ;;  %v223_v9 = vadd.f32 %v221_v5, %v220_v6  ;;  %v246_v30 = vstv %s439_s29  ;;  %s568_s25 = scalar_lea.vmem %s841_s14, 256  ;;  %s647_s13 = smov [#allocation7]  }
  0x4f   : > { %v255_v35 = vmul.f32 %v448_v29, %v787_v1  ;;  %v272_v49 = vmul.f32 %v449_v47, %v787_v1  ;;  %v273_v51 = vmul.f32 %v450_v48, %v787_v1  ;;  %v290_v61 = vmul.f32 %v451_v59, %v787_v1  ;;  %p569_p4 = scmp.ne.s32.totalorder %s841_s14, %s568_s25  ;;  %s572_s26 = sshll.u32 %s647_s13, 4  ;;  %s573_s26 = int_to_ptr.vmem [resolvable:$false] %s572_s26 }
  0x50   : > { %v224_v10 = vadd.f32 %v222_v8, %v795_v7  ;;  %v225_v11 = vadd.f32 %v223_v9, %v795_v7  ;;  %v291_v63 = vmul.f32 %v452_v60, %v787_v1  ;;  %v264_v8 = vstv %s440_s30  ;;  %s574_s27 = scalar_lea.vmem %s573_s26, 512  ;;  %p575_p13 = scmp.lt.s32.totalorder %s841_s14, %s573_s26 }
  0x51   : > { %v282_v12 = vstv %s441_s3  ;;  %p570_p5 = pnand %p569_p4, %p717_p11  ;;  %p576_p2 = scmp.lt.s32.totalorder %s574_s27, %s568_s25 }
  0x52   : > { %531 = vtanh.f32 %v224_v10 }
  0x53   : > { %533 = vtanh.f32 %v225_v11  ;;  %p571_p6 = pneg %p570_p5  ;;  %p577_p0 = por %p576_p2, %p575_p13 }
  0x55   : > { %p578_p3 = pnand %p577_p0, %p571_p6 }
  0x5c   : > { %v532_v15 = vpop.eup %531 }
  0x5d   : > { %v534_v17 = vpop.eup %533  ;;  %v238_v18 = vmul.f32 %v532_v15, %v790_v3  ;;  %v229_v25 = vmul.f32 %v532_v15, %v228_v24 }
  0x5e   : > { %v239_v19 = vmul.f32 %v534_v17, %v790_v3  ;;  %v230_v28 = vmul.f32 %v534_v17, %v228_v24 }
  0x5f   : > { %v240_v20 = vadd.f32 %v238_v18, %v236_v14  ;;  %v231_v31 = vadd.f32 %v229_v25, %v216_v26 }
  0x60   : > { %v241_v21 = vadd.f32 %v239_v19, %v237_v16  ;;  %v232_v34 = vadd.f32 %v230_v28, %v216_v26  ;;  %v453_v16 = vld [vmem:[%s780_s19 + $0x50] sm:$0xff]  ;;  %v454_v19 = vld [vmem:[%s780_s19 + $0x58] sm:$0xff] }
  0x61   : > { %v242_v22 = vadd.f32 %v240_v20, %v795_v7  ;;  %v300_v20 = vstv %s442_s4  ;;  %v309_v25 = vmul.f32 %v454_v19, %v787_v1 }
  0x62   : > { %v243_v23 = vadd.f32 %v241_v21, %v795_v7 }
  0x63   : > { %535 = vtanh.f32 %v242_v22  ;;  %v308_v22 = vmul.f32 %v453_v16, %v787_v1  ;;  %v318_v1 = vstv %s443_s5 }
  0x64   : > { %537 = vtanh.f32 %v243_v23 }
  0x6d   : > { %v536_v33 = vpop.eup %535 }
  0x6e   : > { %v538_v36 = vpop.eup %537  ;;  %v247_v37 = vmul.f32 %v536_v33, %v246_v30  ;;  %v256_v38 = vmul.f32 %v536_v33, %v790_v3 }
  0x6f   : > { %v248_v39 = vmul.f32 %v538_v36, %v246_v30  ;;  %v257_v40 = vmul.f32 %v538_v36, %v790_v3 }
  0x70   : > { %v249_v41 = vadd.f32 %v247_v37, %v231_v31  ;;  %v258_v42 = vadd.f32 %v256_v38, %v254_v32 }
  0x71   : > { %v250_v43 = vadd.f32 %v248_v39, %v232_v34  ;;  %v259_v44 = vadd.f32 %v257_v40, %v255_v35 }
  0x72   : > { %v260_v45 = vadd.f32 %v258_v42, %v795_v7 }
  0x73   : > { %v261_v46 = vadd.f32 %v259_v44, %v795_v7 }
  0x74   : > { %539 = vtanh.f32 %v260_v45 }
  0x75   : > { %541 = vtanh.f32 %v261_v46 }
  0x7e   : > { %v540_v50 = vpop.eup %539 }
  0x7f   : > { %v542_v52 = vpop.eup %541  ;;  %v274_v53 = vmul.f32 %v540_v50, %v790_v3  ;;  %v265_v11 = vmul.f32 %v540_v50, %v264_v8 }
  0x80   : > { %v275_v54 = vmul.f32 %v542_v52, %v790_v3  ;;  %v266_v13 = vmul.f32 %v542_v52, %v264_v8 }
  0x81   : > { %v276_v55 = vadd.f32 %v274_v53, %v272_v49  ;;  %v267_v14 = vadd.f32 %v265_v11, %v249_v41 }
  0x82   : > { %v277_v56 = vadd.f32 %v275_v54, %v273_v51  ;;  %v268_v17 = vadd.f32 %v266_v13, %v250_v43 }
  0x83   : > { %v278_v57 = vadd.f32 %v276_v55, %v795_v7 }
  0x84   : > { %v279_v58 = vadd.f32 %v277_v56, %v795_v7 }
  0x85   : > { %543 = vtanh.f32 %v278_v57 }
  0x86   : > { %545 = vtanh.f32 %v279_v58 }
  0x8f   : > { %v544_v62 = vpop.eup %543 }
  0x90   : > { %v546_v0 = vpop.eup %545  ;;  %v292_v2 = vmul.f32 %v544_v62, %v790_v3  ;;  %v283_v15 = vmul.f32 %v544_v62, %v282_v12 }
  0x91   : > { %v293_v4 = vmul.f32 %v546_v0, %v790_v3  ;;  %v284_v18 = vmul.f32 %v546_v0, %v282_v12 }
  0x92   : > { %v294_v5 = vadd.f32 %v292_v2, %v290_v61  ;;  %v285_v21 = vadd.f32 %v283_v15, %v267_v14 }
  0x93   : > { %v295_v6 = vadd.f32 %v293_v4, %v291_v63  ;;  %v286_v24 = vadd.f32 %v284_v18, %v268_v17 }
  0x94   : > { %v296_v9 = vadd.f32 %v294_v5, %v795_v7 }
  0x95   : > { %v297_v10 = vadd.f32 %v295_v6, %v795_v7 }
  0x96   : > { %547 = vtanh.f32 %v296_v9 }
  0x97   : > { %549 = vtanh.f32 %v297_v10 }
  0xa0   : > { %v548_v23 = vpop.eup %547 }
  0xa1   : > { %v550_v26 = vpop.eup %549  ;;  %v301_v27 = vmul.f32 %v548_v23, %v300_v20  ;;  %v310_v28 = vmul.f32 %v548_v23, %v790_v3 }
  0xa2   : > { %v302_v29 = vmul.f32 %v550_v26, %v300_v20  ;;  %v311_v30 = vmul.f32 %v550_v26, %v790_v3 }
  0xa3   : > { %v303_v31 = vadd.f32 %v301_v27, %v285_v21  ;;  %v312_v32 = vadd.f32 %v310_v28, %v308_v22 }
  0xa4   : > { %v304_v33 = vadd.f32 %v302_v29, %v286_v24  ;;  %v313_v34 = vadd.f32 %v311_v30, %v309_v25 }
  0xa5   : > { %v314_v35 = vadd.f32 %v312_v32, %v795_v7 }
  0xa6   : > { %v315_v36 = vadd.f32 %v313_v34, %v795_v7 }
  0xa7   : > { %551 = vtanh.f32 %v314_v35 }
  0xa8   : > { %553 = vtanh.f32 %v315_v36 }
  0xb1   : > { %v552_v37 = vpop.eup %551 }
  0xb2   : > { %v554_v3 = vpop.eup %553  ;;  %v319_v38 = vmul.f32 %v552_v37, %v318_v1 }
  0xb3   : > { %v320_v39 = vmul.f32 %v554_v3, %v318_v1 }
  0xb4   : > { %v321_v7 = vadd.f32 %v319_v38, %v303_v31 }
  0xb5   : > { %v322_v40 = vadd.f32 %v320_v39, %v304_v33 }
  0xb6   : > { %323 = vst [vmem:[%s198_s7] sm:$0xff] %v321_v7 }
  0xb7   : > { %324 = vst [vmem:[%s198_s7 + $0x8] sm:$0xff] %v322_v40 }
  0xb8   : > { %581 = shalt.err (!%p578_p3)
}
  0xb9   : > { %s582_s20 = scalar_lea.hbm %s846_s23, 256  ;;  %s586_s30 = scalar_lea.hbm %s892_s2, 512 }
  0xba   : > { %p583_p7 = scmp.ne.s32.totalorder %s846_s23, %s582_s20  ;;  %p587_p10 = scmp.lt.u32.totalorder %s846_s23, %s892_s2 }
  0xbb   : > { %p588_p4 = scmp.lt.u32.totalorder %s586_s30, %s582_s20  ;;  %p590_p6 = scmp.lt.u32.totalorder %s582_s20, %s846_s23 }
  0xbc   : > { %p584_p8 = pnand %p583_p7, %p717_p11 }
  0xbd   : > { %p589_p5 = por %p588_p4, %p587_p10 }
  0xbe   : > { %p585_p9 = pneg %p584_p8 }
  0xbf   : > { %p591_p13 = por %p590_p6, %p589_p5 }
  0xc1   : > { %p592_p2 = pnand %p591_p13, %p585_p9 }
  0xc3   : > { %595 = shalt.err (!%p592_p2)
}
  0xc4   : > { %s648_s5 = smov 128   ;;  %s649_s8 = smov 8  }
  0xc5   : > { %477 = dma.vmem_to_hbm [thread:$0]  (%p717_p11), %s841_s14, 256, %s846_s23, %s326_s24, %s648_s5, %s648_s5, %s649_s8  }
  0xc6 PF: > { %s354_s7 = sand.u32 1, %s626_s9   ;;  %p484_p0 = pnand %p427_p1, %p721_p12 }
  0xc7   : > { %s355_s6 = scalar_lea.sflag [#allocation4], %s354_s7 }
  0xc8   : > { %621 = dma.done.wait (!%p484_p0), %s355_s6, 256  }
  0xc9   : > { %623 = vsyncadd (!%p484_p0), %s355_s6, 4294967040  ;;  %p16_p3 = scmp.ge.s32.totalorder %s690_s15, 4   ;;  %s898_s9 = smov %s630_s10 }
  0xca   : > { %s899_s10 = smov %s634_s11  ;;  %s900_s11 = smov %s702_s18 }
  0xcb   : > { %s901_s12 = smov %s690_s15  ;;  %18 = sbr.rel (!%p16_p3) target bundleno = 6 (0x6), region = 88 }
  0xd2   :  { %360 = vsyncpa [#allocation3], 1 }
  0xd3   :  { %362 = vsyncpa [#allocation3 + $0x1], 1 }
  0xd4   :  { %363 = vsyncpa [#allocation4], 1 }
  0xd5   :  { %365 = vsyncpa [#allocation4 + $0x1], 1 }
  0xd6   :  { %366 = vsyncpa [#allocation5], 1 }
  0xd7   :  { %368 = vsyncpa [#allocation5 + $0x1], 1 }

</bundles_post_ra>
